<compile_context>
chip_gen: v5e
topology: v5e:2x2
jax: 0.10.0
libtpu: 0.0.40
codegen_flags: <defaults>
</compile_context>

<pallas_src>
import functools

import jax
import jax.numpy as jnp
from jax.experimental import pallas as pl
from jax.experimental.pallas import tpu as pltpu

HID1 = 32
FEAT_DIM = 16


def _mlp_kernel(x_ref, w1_ref, b1_ref, w2_ref, b2_ref, w3t_ref, b3_ref,
                prob_ref, feat_ref):
    x = x_ref[...]                                                # (TILE, D) f32

    # fc1 + ReLU (MXU matmul, f32 accumulate)
    h1 = jnp.dot(x, w1_ref[...], preferred_element_type=jnp.float32)
    h1 = jnp.maximum(h1 + b1_ref[...], 0.0)                       # (TILE, 32)

    # dropout: identity (eval-mode forward)

    # fc2 -> extract_feat
    feat = jnp.dot(h1, w2_ref[...], preferred_element_type=jnp.float32)
    feat = feat + b2_ref[...]                                     # (TILE, 16)
    feat_ref[...] = feat

    # dropout: identity (eval-mode forward)

    # fc3 as a lane-reduce (VPU mul + XLU reduce; avoids a 1-wide matmul),
    # then sigmoid only on the single logit column.
    logit = jnp.sum(feat * w3t_ref[...], axis=-1, keepdims=True) + b3_ref[...]
    prob_ref[...] = jax.nn.sigmoid(logit)                         # (TILE, 1)


def _round_up(v, m):
    return (v + m - 1) // m * m


@functools.partial(jax.jit, static_argnames=("tile_n",))
def network_forward(x, params, tile_n=4096):
    """x: (N, input_dim) f32. params: dict of w1,b1,w2,b2,w3,b3 (W as (in,out)).
    Returns [prob (N,1), extract_feat (N,16)] like the PyTorch module."""
    N, D = x.shape
    w1, b1 = params["w1"], params["b1"]      # (D,32), (1,32)
    w2, b2 = params["w2"], params["b2"]      # (32,16), (1,16)
    w3, b3 = params["w3"], params["b3"]      # (16,1),  (1,1)
    w3t = w3.T                               # (1,16): row form for lane-reduce fc3

    # Tile selection:
    #  * aim for >=4 grid steps (fills both TCs on v7x, keeps double-buffering
    #    alive on all chips),
    #  * but never drop below 512 rows per step (or the whole batch if smaller)
    #    so per-step overhead stays amortized,
    #  * and cap at tile_n (default 4096) to respect the v7x VMEM budget.
    tile = _round_up(pl.cdiv(N, 4), 8)
    tile = max(tile, min(_round_up(N, 8), 512))
    tile = min(tile, tile_n)
    grid = (pl.cdiv(N, tile),)               # ragged last block handled by Pallas masking

    cost = pl.CostEstimate(
        flops=2 * N * D * HID1 + 2 * N * HID1 * FEAT_DIM + 2 * N * FEAT_DIM,
        transcendentals=N,
        bytes_accessed=(N * D + N * (FEAT_DIM + 1)
                        + D * HID1 + HID1
                        + HID1 * FEAT_DIM + FEAT_DIM + FEAT_DIM + 1) * 4,
    )

    prob, feat = pl.pallas_call(
        _mlp_kernel,
        out_shape=(jax.ShapeDtypeStruct((N, 1), jnp.float32),
                   jax.ShapeDtypeStruct((N, FEAT_DIM), jnp.float32)),
        grid=grid,
        in_specs=[
            pl.BlockSpec((tile, D), lambda i: (i, 0)),       # x: streamed row tiles
            pl.BlockSpec(w1.shape, lambda i: (0, 0)),        # weights/biases: resident
            pl.BlockSpec(b1.shape, lambda i: (0, 0)),
            pl.BlockSpec(w2.shape, lambda i: (0, 0)),
            pl.BlockSpec(b2.shape, lambda i: (0, 0)),
            pl.BlockSpec(w3t.shape, lambda i: (0, 0)),
            pl.BlockSpec(b3.shape, lambda i: (0, 0)),
        ],
        out_specs=(pl.BlockSpec((tile, 1), lambda i: (i, 0)),
                   pl.BlockSpec((tile, FEAT_DIM), lambda i: (i, 0))),
        compiler_params=pltpu.CompilerParams(
            dimension_semantics=("parallel",),               # shard tiles on v7x's 2 TCs
            vmem_limit_bytes=48 * 1024 * 1024,               # headroom at tile=4096; fits v7x 64MiB
        ),
        cost_estimate=cost,
    )(x, w1, b1, w2, b2, w3t, b3)

    return [prob, feat]


def init_params(key, input_dim):
    """Deterministic synthetic init (PyTorch-Linear-style uniform bounds)."""
    ks = jax.random.split(key, 6)

    def lin(kw, kb, fan_in, fan_out):
        bound = 1.0 / jnp.sqrt(jnp.float32(fan_in))
        w = jax.random.uniform(kw, (fan_in, fan_out), jnp.float32, -bound, bound)
        b = jax.random.uniform(kb, (1, fan_out), jnp.float32, -bound, bound)
        return w, b

    w1, b1 = lin(ks[0], ks[1], input_dim, HID1)
    w2, b2 = lin(ks[2], ks[3], HID1, FEAT_DIM)
    w3, b3 = lin(ks[4], ks[5], FEAT_DIM, 1)
    return {"w1": w1, "b1": b1, "w2": w2, "b2": b2, "w3": w3, "b3": b3}


def _reference(x, p):
    h1 = jnp.maximum(x @ p["w1"] + p["b1"], 0.0)
    feat = h1 @ p["w2"] + p["b2"]
    prob = jax.nn.sigmoid(feat @ p["w3"] + p["b3"])
    return prob, feat


if __name__ == "__main__":
    key = jax.random.PRNGKey(0)
    k_x, k_p, k_x2 = jax.random.split(key, 3)

    INPUT_DIM = 64
    params = init_params(k_p, INPUT_DIM)

    # Small batch (single-tile path, exact block).
    N = 8
    x = jax.random.normal(k_x, (N, INPUT_DIM), dtype=jnp.float32)
    prob, feat = network_forward(x, params)
    jax.block_until_ready((prob, feat))
    prob_r, feat_r = _reference(x, params)
    assert prob.shape == (N, 1) and feat.shape == (N, FEAT_DIM)
    assert jnp.allclose(prob, prob_r, atol=1e-5)
    assert jnp.allclose(feat, feat_r, atol=1e-5)

    # Non-multiple, multi-tile batch (exercises the pad-free ragged last block
    # and the >=4-step parallel grid).
    N2 = 2050
    x2 = jax.random.normal(k_x2, (N2, INPUT_DIM), dtype=jnp.float32)
    prob2, feat2 = network_forward(x2, params)
    jax.block_until_ready((prob2, feat2))
    prob2_r, feat2_r = _reference(x2, params)
    assert prob2.shape == (N2, 1) and feat2.shape == (N2, FEAT_DIM)
    assert jnp.allclose(prob2, prob2_r, atol=1e-5)
    assert jnp.allclose(feat2, feat2_r, atol=1e-5)

    print("KERNEL_OK")
</pallas_src>

<mosaic_0001>
module attributes {stable_mosaic.version = 11 : i64} {
  func.func @_mlp_kernel(%arg0: i32, %arg1: memref<8x64xf32, #tpu.memory_space<vmem>>, %arg2: memref<64x32xf32, #tpu.memory_space<vmem>>, %arg3: memref<1x32xf32, #tpu.memory_space<vmem>>, %arg4: memref<32x16xf32, #tpu.memory_space<vmem>>, %arg5: memref<1x16xf32, #tpu.memory_space<vmem>>, %arg6: memref<1x16xf32, #tpu.memory_space<vmem>>, %arg7: memref<1x1xf32, #tpu.memory_space<vmem>>, %arg8: memref<8x1xf32, #tpu.memory_space<vmem>>, %arg9: memref<8x16xf32, #tpu.memory_space<vmem>>) attributes {dimension_semantics = [#tpu.dimension_semantics<parallel>], iteration_bounds = array<i64: 1>, scalar_prefetch = 0 : i64, scratch_operands = 0 : i64, tpu.core_type = #tpu.core_type<tc>, window_params = [{transform_indices = @transform_0, window_bounds = array<i64: 8, 64>}, {pipeline_mode = #tpu.pipeline_mode<synchronous>, transform_indices = @transform_1, window_bounds = array<i64: 64, 32>}, {pipeline_mode = #tpu.pipeline_mode<synchronous>, transform_indices = @transform_2, window_bounds = array<i64: 1, 32>}, {pipeline_mode = #tpu.pipeline_mode<synchronous>, transform_indices = @transform_3, window_bounds = array<i64: 32, 16>}, {pipeline_mode = #tpu.pipeline_mode<synchronous>, transform_indices = @transform_4, window_bounds = array<i64: 1, 16>}, {pipeline_mode = #tpu.pipeline_mode<synchronous>, transform_indices = @transform_5, window_bounds = array<i64: 1, 16>}, {pipeline_mode = #tpu.pipeline_mode<synchronous>, transform_indices = @transform_6, window_bounds = array<i64: 1, 1>}, {transform_indices = @transform_7, window_bounds = array<i64: 8, 1>}, {transform_indices = @transform_8, window_bounds = array<i64: 8, 16>}]} {
    %c0 = arith.constant 0 : index
    %c0_0 = arith.constant 0 : index
    %0 = vector.load %arg1[%c0, %c0_0] : memref<8x64xf32, #tpu.memory_space<vmem>>, vector<8x64xf32>
    %c0_1 = arith.constant 0 : index
    %c0_2 = arith.constant 0 : index
    %1 = vector.load %arg2[%c0_1, %c0_2] : memref<64x32xf32, #tpu.memory_space<vmem>>, vector<64x32xf32>
    %cst = arith.constant dense<0.000000e+00> : vector<8x32xf32>
    %2 = tpu.matmul %0, %1, %cst {dimension_numbers = #tpu.dot_dimension_numbers<[1], [0], [0], [1], [0, 0, 1, 1], [], []>} : vector<8x64xf32>, vector<64x32xf32>, vector<8x32xf32> -> vector<8x32xf32>
    %c0_3 = arith.constant 0 : index
    %c0_4 = arith.constant 0 : index
    %3 = vector.load %arg3[%c0_3, %c0_4] : memref<1x32xf32, #tpu.memory_space<vmem>>, vector<1x32xf32>
    %4 = vector.broadcast %3 : vector<1x32xf32> to vector<8x32xf32>
    %5 = arith.addf %2, %4 : vector<8x32xf32>
    %cst_5 = arith.constant 0.000000e+00 : f32
    %6 = vector.broadcast %cst_5 : f32 to vector<8x32xf32>
    %7 = arith.maximumf %5, %6 : vector<8x32xf32>
    %c0_6 = arith.constant 0 : index
    %c0_7 = arith.constant 0 : index
    %8 = vector.load %arg4[%c0_6, %c0_7] : memref<32x16xf32, #tpu.memory_space<vmem>>, vector<32x16xf32>
    %cst_8 = arith.constant dense<0.000000e+00> : vector<8x16xf32>
    %9 = tpu.matmul %7, %8, %cst_8 {dimension_numbers = #tpu.dot_dimension_numbers<[1], [0], [0], [1], [0, 0, 1, 1], [], []>} : vector<8x32xf32>, vector<32x16xf32>, vector<8x16xf32> -> vector<8x16xf32>
    %c0_9 = arith.constant 0 : index
    %c0_10 = arith.constant 0 : index
    %10 = vector.load %arg5[%c0_9, %c0_10] : memref<1x16xf32, #tpu.memory_space<vmem>>, vector<1x16xf32>
    %11 = vector.broadcast %10 : vector<1x16xf32> to vector<8x16xf32>
    %12 = arith.addf %9, %11 : vector<8x16xf32>
    %c0_11 = arith.constant 0 : index
    %c0_12 = arith.constant 0 : index
    %13 = vector.load %arg9[%c0_11, %c0_12] : memref<8x16xf32, #tpu.memory_space<vmem>>, vector<8x16xf32>
    tpu.vector_store %arg9[%c0_11, %c0_12], %12 {strides = array<i32>} : memref<8x16xf32, #tpu.memory_space<vmem>>, vector<8x16xf32>,
    %c0_13 = arith.constant 0 : index
    %c0_14 = arith.constant 0 : index
    %14 = vector.load %arg6[%c0_13, %c0_14] : memref<1x16xf32, #tpu.memory_space<vmem>>, vector<1x16xf32>
    %15 = vector.broadcast %14 : vector<1x16xf32> to vector<8x16xf32>
    %16 = arith.mulf %12, %15 : vector<8x16xf32>
    %cst_15 = arith.constant dense<0.000000e+00> : vector<8xf32>
    %17 = vector.multi_reduction <add>, %16, %cst_15 [1] : vector<8x16xf32> to vector<8xf32>
    %18 = vector.shape_cast %17 : vector<8xf32> to vector<8x1xf32>
    %c0_16 = arith.constant 0 : index
    %c0_17 = arith.constant 0 : index
    %19 = vector.load %arg7[%c0_16, %c0_17] : memref<1x1xf32, #tpu.memory_space<vmem>>, vector<1x1xf32>
    %20 = vector.broadcast %19 : vector<1x1xf32> to vector<8x1xf32>
    %21 = arith.addf %18, %20 : vector<8x1xf32>
    %22 = arith.negf %21 : vector<8x1xf32>
    %23 = math.exp %22 : vector<8x1xf32>
    %cst_18 = arith.constant 1.000000e+00 : f32
    %24 = vector.broadcast %cst_18 : f32 to vector<8x1xf32>
    %25 = arith.addf %24, %23 : vector<8x1xf32>
    %26 = arith.divf %24, %25 : vector<8x1xf32>
    %c0_19 = arith.constant 0 : index
    %c0_20 = arith.constant 0 : index
    %27 = vector.load %arg8[%c0_19, %c0_20] : memref<8x1xf32, #tpu.memory_space<vmem>>, vector<8x1xf32>
    tpu.vector_store %arg8[%c0_19, %c0_20], %26 {strides = array<i32>} : memref<8x1xf32, #tpu.memory_space<vmem>>, vector<8x1xf32>,
    return
  }
  func.func @transform_0(%arg0: i32) -> (i32, i32) {
    %c0_i32 = arith.constant 0 : i32
    %c0_i32_0 = arith.constant 0 : i32
    return %arg0, %c0_i32 : i32, i32
  }
  func.func @transform_1(%arg0: i32) -> (i32, i32) {
    %c0_i32 = arith.constant 0 : i32
    %c0_i32_0 = arith.constant 0 : i32
    %c0_i32_1 = arith.constant 0 : i32
    return %c0_i32, %c0_i32_0 : i32, i32
  }
  func.func @transform_2(%arg0: i32) -> (i32, i32) {
    %c0_i32 = arith.constant 0 : i32
    %c0_i32_0 = arith.constant 0 : i32
    %c0_i32_1 = arith.constant 0 : i32
    return %c0_i32, %c0_i32_0 : i32, i32
  }
  func.func @transform_3(%arg0: i32) -> (i32, i32) {
    %c0_i32 = arith.constant 0 : i32
    %c0_i32_0 = arith.constant 0 : i32
    %c0_i32_1 = arith.constant 0 : i32
    return %c0_i32, %c0_i32_0 : i32, i32
  }
  func.func @transform_4(%arg0: i32) -> (i32, i32) {
    %c0_i32 = arith.constant 0 : i32
    %c0_i32_0 = arith.constant 0 : i32
    %c0_i32_1 = arith.constant 0 : i32
    return %c0_i32, %c0_i32_0 : i32, i32
  }
  func.func @transform_5(%arg0: i32) -> (i32, i32) {
    %c0_i32 = arith.constant 0 : i32
    %c0_i32_0 = arith.constant 0 : i32
    %c0_i32_1 = arith.constant 0 : i32
    return %c0_i32, %c0_i32_0 : i32, i32
  }
  func.func @transform_6(%arg0: i32) -> (i32, i32) {
    %c0_i32 = arith.constant 0 : i32
    %c0_i32_0 = arith.constant 0 : i32
    %c0_i32_1 = arith.constant 0 : i32
    return %c0_i32, %c0_i32_0 : i32, i32
  }
  func.func @transform_7(%arg0: i32) -> (i32, i32) {
    %c0_i32 = arith.constant 0 : i32
    %c0_i32_0 = arith.constant 0 : i32
    return %arg0, %c0_i32 : i32, i32
  }
  func.func @transform_8(%arg0: i32) -> (i32, i32) {
    %c0_i32 = arith.constant 0 : i32
    %c0_i32_0 = arith.constant 0 : i32
    return %arg0, %c0_i32 : i32, i32
  }
}

</mosaic_0001>

<bundles_post_ra>
// kernel: network_forward.1
= control target key start
LH: loop header
LB: loop body
LE: loop exit
PB: predicated region body
PF: predicated region fallthrough
CT: control target
= control target key end

     0   :  { %s298_s0 = inlined_call_operand.vmem [shape: f32[8,64], index: 0, kind: input, shape index: {}]   ;;  %s299_s1 = inlined_call_operand.vmem [shape: f32[64,32], index: 1, kind: input, shape index: {}]   ;;  %s300_s2 = inlined_call_operand.vmem [shape: f32[1,32], index: 2, kind: input, shape index: {}]   ;;  %s301_s3 = inlined_call_operand.vmem [shape: f32[32,16], index: 3, kind: input, shape index: {}]   ;;  %s302_s4 = inlined_call_operand.vmem [shape: f32[1,16], index: 4, kind: input, shape index: {}]   ;;  %s303_s5 = inlined_call_operand.vmem [shape: f32[1,16], index: 5, kind: input, shape index: {}]   ;;  %s304_s6 = inlined_call_operand.<no memory space> [shape: f32[1,1], index: 6, kind: input, shape index: {}]   ;;  %s305_s7 = inlined_call_operand.vmem [shape: f32[8,1], index: 7, kind: output, shape index: {0}]   ;;  %s306_s8 = inlined_call_operand.hbm [shape: f32[8,16], index: 8, kind: output, shape index: {1}]  }
   0x1   :  { %v14_v0 = vstv %s304_s6 }
   0x2   :  { %15 = vst [vmem:[#allocation2] sm:$0x1] %v14_v0 }
   0x3   :  { %v39_v1 = vld [vmem:[%s299_s1 + $0x38] sm:$0xff]  ;;  %v38_v2 = vld [vmem:[%s299_s1 + $0x30] sm:$0xff]  ;;  %v37_v3 = vld [vmem:[%s299_s1 + $0x28] sm:$0xff] }
   0x4   :  { %56 = vmatpush.msra.mxu0 %v39_v1  ;;  %v36_v4 = vld [vmem:[%s299_s1 + $0x20] sm:$0xff]  ;;  %v72_v5 = vld [vmem:[%s301_s3 + $0x18] sm:$0xff] }
   0x5   :  { %93 = vmatpush.msra.mxu1 %v72_v5 }
   0x6   :  { %57 = vmatpush.msra.mxu0 %v38_v2 }
   0x8   :  { %58 = vmatpush.msra.mxu0 %v37_v3 }
   0x9   :  { %16 = vsyncpa [#allocation4], 0  ;;  %v35_v6 = vld [vmem:[%s299_s1 + $0x18] sm:$0xff]  ;;  %v34_v7 = vld [vmem:[%s299_s1 + $0x10] sm:$0xff]  ;;  %vm44_vm0 = vcmask 523264   ;;  %vm77_vm1 = vcmask 261120  }
   0xa   :  { %59 = vmatpush.msra.mxu0 %v36_v4  ;;  %v33_v8 = vld [vmem:[%s299_s1 + $0x8] sm:$0xff]  ;;  %v32_v9 = vld [vmem:[%s299_s1] sm:$0xff]  ;;  %v71_v11 = vld [vmem:[%s301_s3 + $0x10] sm:$0xff]  ;;  %vm101_vm2 = vcmask 130048   ;;  %s146_s15 = sshll.u32 %s306_s8, 4  ;;  %vm135_vm6 = vcmask 7168   ;;  %s147_s15 = int_to_ptr.hbm [resolvable:$true] %s146_s15 }
   0xb   :  { %v31_v10 = vld [vmem:[%s298_s0] sm:$0xff]  ;;  %94 = vmatpush.msra.mxu1 %v71_v11  ;;  %v70_v12 = vld [vmem:[%s301_s3 + $0x8] sm:$0xff] }
   0xc   :  { %60 = vmatpush.msra.mxu0 %v35_v6  ;;  %v69_v13 = vld [vmem:[%s301_s3] sm:$0xff] }
   0xd   :  { %95 = vmatpush.msra.mxu1 %v70_v12  ;;  %v161_v14 = vld [vmem:[%s300_s2] ss:$0 sm:$0xff]  ;;  %s195_s2 = smov [#allocation3]  }
   0xe   :  { %61 = vmatpush.msra.mxu0 %v34_v7  ;;  %v162_v18 = vld [vmem:[%s302_s4] ss:$0 sm:$0xff]  ;;  %s144_s3 = sshll.u32 %s195_s2, 4  ;;  %s145_s3 = int_to_ptr.vmem [resolvable:$true] %s144_s3 }
   0xf   :  { %96 = vmatpush.msra.mxu1 %v69_v13  ;;  %v163_v19 = vld [vmem:[%s303_s5] ss:$0 sm:$0xff] }
  0x10   :  { %62 = vmatpush.msra.mxu0 %v33_v8  ;;  %v164_v24 = vld [vmem:[#allocation2] ss:$0 sm:$0xff] }
  0x12   :  { %63 = vmatpush.msra.mxu0 %v32_v9 }
  0x13   :  { %157 = vmatmul.msk.f32.vlgmr.msra.gmra.mxu0 %vm44_vm0, %v31_v10 }
  0x90   :  { %v65_v15 = vpop.f32.mrf.mxu0 }
  0x91   :  { %v66_v16 = vadd.f32 %v161_v14, %v65_v15 }
  0x93   :  { %v68_v17 = vmax.f32 %v66_v16, 0.0 }
  0x95   :  { %158 = vmatmul.msk.f32.vlgmr.msra.gmra.mxu1 %vm77_vm1, %v68_v17 }
 0x112   :  { %v98_v20 = vpop.f32.mrf.mxu1 }
 0x113   :  { %v99_v21 = vadd.f32 %v162_v18, %v98_v20 }
 0x115   :  { %102 = vst.msk [vmem:[#allocation3] sm:$0xff] %vm101_vm2, %v99_v21  ;;  %v107_v22 = vmul.f32 %v163_v19, %v99_v21 }
 0x116   :  { %149 = dma.vmem_to_hbm [thread:$0]  %s145_s3, 128, %s147_s15, [#allocation4]  }
 0x117   :  { %v108_v23 = vsel %vm101_vm2, %v107_v22, 0.0 }
 0x118   :  { %109 = vadd.xlane.f32.xlu0 %v108_v23 }
 0x18b   :  { %v110_v25 = vpop.xlane.xlu0 %109 }
 0x18c   :  { %v115_v26 = vadd.f32 %v164_v24, %v110_v25 }
 0x18e   :  { %v159_v27 = vmul.f32 -1.442695, %v115_v26 }
 0x190   :  { %165 = vpow2.f32 %v159_v27 }
 0x196   :  { %v166_v28 = vpop.eup %165 }
 0x197   :  { %v119_v29 = vadd.f32 1.0, %v166_v28 }
 0x199   :  { %167 = vrcp.f32 %v119_v29  ;;  %v131_v33 = vand.u32 2147483648, %v119_v29  ;;  %v129_v35 = vand.u32 2147483647, %v119_v29  ;;  %vm125_vm4 = vweird.f32 %v119_v29 }
 0x19b   :  { %v132_v37 = vor.u32 1.1754944e-38, %v131_v33  ;;  %vm130_vm7 = vcmp.eq.f32.partialorder %v129_v35, 8.507059e+37 }
 0x19f   :  { %v168_v30 = vpop.eup %167 }
 0x1a0   :  { %v121_v31 = vmul.f32 %v168_v30, %v119_v29  ;;  %vm126_vm3 = vweird.f32 %v168_v30 }
 0x1a1   :  { %vm127_vm5 = vmor %vm125_vm4, %vm126_vm3 }
 0x1a2   :  { %v122_v32 = vsub.f32 1.0, %v121_v31 }
 0x1a4   :  { %v123_v34 = vmul.f32 %v168_v30, %v122_v32 }
 0x1a6   :  { %v124_v36 = vadd.f32 %v168_v30, %v123_v34 }
 0x1a8   :  { %v128_v38 = vsel %vm127_vm5, %v168_v30, %v124_v36 }
 0x1a9   :  { %v133_v39 = vsel %vm130_vm7, %v132_v37, %v128_v38 }
 0x1aa   :  { %136 = vst.msk [vmem:[%s305_s7] sm:$0xff] %vm135_vm6, %v133_v39 }
 0x1ab   :  { %193 = dma.done.wait [#allocation4], 128  }
 0x1ac   :  { %194 = vsyncadd [#allocation4], 4294967168 }
 0x1ad   :  { %156 = vsyncpa [#allocation4], 1 }

</bundles_post_ra>
